<compile_context>
chip_gen: v6e
topology: v6e:2x2x1
jax: 0.10.0
libtpu: 0.0.40
codegen_flags: <defaults>
</compile_context>

<pallas_src>
import functools

import numpy as np
import jax
import jax.numpy as jnp
from jax.experimental import pallas as pl
from jax.experimental.pallas import tpu as pltpu

LANE = 128


def _round_up(x, m):
    return (x + m - 1) // m * m


# ---------------------------------------------------------------------------
# Pallas kernels
# ---------------------------------------------------------------------------
def _heads_kernel(x3_ref, x2_ref, m_ref, w_ref, b_ref, perobj_ref, glob_ref):
    """Fused masked-mean-pool + all classification heads.

    x3: (B, M, D) f32, x2: (B*M, D) f32 (same data, collapsed outside the kernel to avoid
    an in-kernel reshape across tile padding), m: (B, M, 1) f32 object mask,
    w: (D, 3*128) packed [object | action | not_exist] head weights, b: (1, 3*128).
    perobj: (B*M, 3*128) per-object logits; glob: (B, 3*128) logits of the pooled row.
    """
    w = w_ref[...]
    bias = b_ref[...]
    perobj_ref[...] = jnp.dot(x2_ref[...], w, preferred_element_type=jnp.float32) + bias
    x3 = x3_ref[...]
    m = m_ref[...]
    cnt = jnp.maximum(jnp.sum(m, axis=1), 1.0)          # guard all-masked rows (orig: NaN)
    pooled = jnp.sum(x3 * m, axis=1) / cnt              # (B, D)
    glob_ref[...] = jnp.dot(pooled, w, preferred_element_type=jnp.float32) + bias


def _heads_pallas(x3, x2, mask3, w_heads, b_heads):
    B, M, _ = x3.shape
    N = w_heads.shape[1]
    return pl.pallas_call(
        _heads_kernel,
        out_shape=(jax.ShapeDtypeStruct((B * M, N), jnp.float32),
                   jax.ShapeDtypeStruct((B, N), jnp.float32)),
        in_specs=[pl.BlockSpec(memory_space=pltpu.MemorySpace.VMEM)] * 5,
        out_specs=(pl.BlockSpec(memory_space=pltpu.MemorySpace.VMEM),
                   pl.BlockSpec(memory_space=pltpu.MemorySpace.VMEM)),
    )(x3, x2, mask3, w_heads, b_heads)


def _pair_kernel(flags_ref, ce_ref, sel_i_ref, sel_j_ref, w1_ref, w2_ref,
                 b_ref, const_ref, valid_ref, out_ref):
    """Fused pair-feature gather + temporal_relation_cls for one (batch, pair-block).

    Instead of materializing [ce[i] | ce[j]] rows it projects comp_emb once
    (proj = ce @ w_half, (K, T)) and selects pair rows with static one-hot matmuls:
        logits = sel_i @ proj1 + sel_j @ proj2 + b
    Blocks with no valid pair (SMEM-prefetched flag) skip all matmuls and just store the
    constant logits of a '-1-filled' feature row (original padding semantics).
    """
    b = pl.program_id(0)
    p = pl.program_id(1)
    _, PB, T = out_ref.shape
    const = const_ref[...]                                        # (1, T)

    @pl.when(flags_ref[b, p] == 0)
    def _():
        out_ref[0] = jnp.broadcast_to(const, (PB, T))

    @pl.when(flags_ref[b, p] != 0)
    def _():
        ce = ce_ref[0]                                            # (K, F) bf16
        proj1 = jnp.dot(ce, w1_ref[...], preferred_element_type=jnp.float32)   # (K, T)
        proj2 = jnp.dot(ce, w2_ref[...], preferred_element_type=jnp.float32)   # (K, T)
        si = sel_i_ref[...].astype(jnp.float32)                   # (PB, K) exact one-hot
        sj = sel_j_ref[...].astype(jnp.float32)
        logits = (jnp.dot(si, proj1, preferred_element_type=jnp.float32)
                  + jnp.dot(sj, proj2, preferred_element_type=jnp.float32)
                  + b_ref[...])                                   # (PB, T)
        vmask = valid_ref[0]                                      # (PB, 1)
        out_ref[0] = jnp.where(vmask > 0.5, logits, const)


def _pair_logits_pallas(comp_emb_b16, valid_col, flags, packed, meta):
    B, K, F = comp_emb_b16.shape
    PB, NB, Pp, P = meta['PB'], meta['NB'], meta['Pp'], meta['P']
    T = packed['b_pair'].shape[1]
    out = pl.pallas_call(
        _pair_kernel,
        out_shape=jax.ShapeDtypeStruct((B, Pp, T), jnp.float32),
        grid_spec=pltpu.PrefetchScalarGridSpec(
            num_scalar_prefetch=1,                 # per-(batch, block) any-valid flags
            grid=(B, NB),
            in_specs=[
                pl.BlockSpec((1, K, F), lambda b, p, flags: (b, 0, 0)),
                pl.BlockSpec((PB, K), lambda b, p, flags: (p, 0)),
                pl.BlockSpec((PB, K), lambda b, p, flags: (p, 0)),
                pl.BlockSpec((F, T), lambda b, p, flags: (0, 0)),
                pl.BlockSpec((F, T), lambda b, p, flags: (0, 0)),
                pl.BlockSpec((1, T), lambda b, p, flags: (0, 0)),
                pl.BlockSpec((1, T), lambda b, p, flags: (0, 0)),
                pl.BlockSpec((1, PB, 1), lambda b, p, flags: (b, p, 0)),
            ],
            out_specs=pl.BlockSpec((1, PB, T), lambda b, p, flags: (b, p, 0)),
        ),
        compiler_params=pltpu.CompilerParams(
            # both axes independent -> shards across v7x's 2 TensorCores; no-op on v5e/v6e
            dimension_semantics=("parallel", "parallel")),
    )(flags, comp_emb_b16, packed['sel_i'], packed['sel_j'],
      packed['w1'], packed['w2'], packed['b_pair'], packed['const_pair'], valid_col)
    return out[:, :P, :]


# ---------------------------------------------------------------------------
# Parameter init / one-time packing (all layout work hoisted out of the forward)
# ---------------------------------------------------------------------------
def init_params(key, cfg):
    D, E = cfg['input_dim'], cfg['embed_dim']
    final_dim = 2 * (D + 2 * E)

    def linear_init(k, fan_out, fan_in):
        kw, kb = jax.random.split(k)
        bound = 1.0 / float(np.sqrt(fan_in))
        w = jax.random.uniform(kw, (fan_out, fan_in), jnp.float32, -bound, bound)
        b = jax.random.uniform(kb, (fan_out,), jnp.float32, -bound, bound)
        return w, b

    ks = jax.random.split(key, 6)
    return {
        'object_cls': linear_init(ks[0], cfg['num_object'], D),
        'action_cls': linear_init(ks[1], cfg['num_action'], D),
        'not_exist_cls': linear_init(ks[2], cfg['num_classes'], D),
        'temporal_relation_cls': linear_init(ks[3], cfg['num_temporal_relations'], final_dim),
        'object_lookup': jax.random.normal(ks[4], (cfg['num_object'], E), jnp.float32),
        'action_lookup': jax.random.normal(ks[5], (cfg['num_action'], E), jnp.float32),
    }


def build_comp_map(cfg):
    # Deterministic stand-in for the comp_map .npy file (no file I/O allowed).
    num_aa = cfg['num_object'] * cfg['num_action']
    T, C = cfg['num_temporal_relations'], cfg['num_classes']
    table = (np.arange(num_aa * num_aa * T, dtype=np.int64)
             .reshape(num_aa, num_aa, T) * 7 + 3) % C
    return jnp.asarray(table, jnp.int32), num_aa


def pack_params(params, cfg, max_objs, pair_block_rows=512):
    """One-time layout prep: transposed / lane-packed head weights, bf16 pair weights,
    static all-pairs enumeration and one-hot selection matrices.

    pair_block_rows: pair rows per grid step (multiple of 8).  512-2048 is a good range
    on v5e/v6e; keep <= 2048 on v7x (64 MiB VMEM) -- footprint here is tiny either way.
    """
    D, E = cfg['input_dim'], cfg['embed_dim']
    A = cfg['num_action']
    T = cfg['num_temporal_relations']
    F = D + 2 * E
    K = max_objs * A

    def pad_head(w, b):   # PyTorch Linear (out, in) -> transposed (D, 128) + (128,) bias
        wt = jnp.transpose(w)
        return (jnp.pad(wt, ((0, 0), (0, LANE - wt.shape[1]))),
                jnp.pad(b, (0, LANE - b.shape[0])))

    wo, bo = params['object_cls']
    wa, ba = params['action_cls']
    wn, bn = params['not_exist_cls']
    wop, bop = pad_head(wo, bo)
    wap, bap = pad_head(wa, ba)
    wnp_, bnp_ = pad_head(wn, bn)
    w_heads = jnp.concatenate([wop, wap, wnp_], axis=1)            # (D, 3*128)
    b_heads = jnp.concatenate([bop, bap, bnp_]).reshape(1, 3 * LANE)

    wt_, bt_ = params['temporal_relation_cls']                     # (T, 2F), (T,)
    w_pairT = jnp.transpose(wt_)                                   # (2F, T)
    w1 = w_pairT[:F].astype(jnp.bfloat16)                          # bf16 MXU operands
    w2 = w_pairT[F:].astype(jnp.bfloat16)
    b_pair = bt_.reshape(1, T).astype(jnp.float32)
    w12_f32 = jnp.concatenate([w1, w2], axis=0).astype(jnp.float32)
    # constant logits of a '-1 filled' (invalid / padded) pair feature row
    const_pair = b_pair - jnp.sum(w12_f32, axis=0, keepdims=True)

    # static all-pairs enumeration + one-hot row-selection matrices (bf16: exact 0/1)
    pairs = np.array([(i, j) for i in range(K) for j in range(K) if i != j],
                     dtype=np.int32)
    P = pairs.shape[0]
    PB = _round_up(min(pair_block_rows, _round_up(P, 8)), 8)
    Pp = _round_up(P, PB)
    NB = Pp // PB
    sel_i = np.zeros((Pp, K), np.float32)
    sel_j = np.zeros((Pp, K), np.float32)
    sel_i[np.arange(P), pairs[:, 0]] = 1.0
    sel_j[np.arange(P), pairs[:, 1]] = 1.0

    aa_tr, num_aa = build_comp_map(cfg)

    packed = {
        'w_heads': w_heads, 'b_heads': b_heads,
        'w1': w1, 'w2': w2, 'b_pair': b_pair, 'const_pair': const_pair,
        'sel_i': jnp.asarray(sel_i).astype(jnp.bfloat16),
        'sel_j': jnp.asarray(sel_j).astype(jnp.bfloat16),
        'pair_i': jnp.asarray(pairs[:, 0]),
        'pair_j': jnp.asarray(pairs[:, 1]),
        'object_lookup': params['object_lookup'],
        'action_lookup': params['action_lookup'],
        'aa_aa_tr_to_caidx': aa_tr,
    }
    meta = dict(P=P, PB=PB, NB=NB, Pp=Pp, K=K, F=F, num_aa=num_aa)
    return packed, meta


# ---------------------------------------------------------------------------
# Forward pass (is_eval=False path)
# ---------------------------------------------------------------------------
def edm_task2_forward(packed, inp, objmask, AAidxs_tgts, TR_tgts, *,
                      cfg, meta, use_pallas=True):
    B, M, D = inp.shape
    NO = cfg['num_object']
    A = cfg['num_action']
    T = cfg['num_temporal_relations']
    C = cfg['num_classes']
    thres = cfg['act_threshold']
    K, F = meta['K'], meta['F']
    P, PB, NB, Pp = meta['P'], meta['PB'], meta['NB'], meta['Pp']
    hp = jax.lax.Precision.HIGHEST

    # ---- stage 1: fused masked-mean-pool + object / action / not_exist heads ----
    mask3 = objmask.astype(jnp.float32)[..., None]                 # (B, M, 1)
    x2 = inp.reshape(B * M, D)
    if use_pallas:
        perobj, glob = _heads_pallas(inp, x2, mask3, packed['w_heads'], packed['b_heads'])
    else:
        cnt = jnp.maximum(jnp.sum(mask3, axis=1), 1.0)
        pooled = jnp.sum(inp * mask3, axis=1) / cnt
        perobj = jnp.dot(x2, packed['w_heads'], precision=hp) + packed['b_heads']
        glob = jnp.dot(pooled, packed['w_heads'], precision=hp) + packed['b_heads']
    obj_out = perobj[:, :NO].reshape(B, M, NO)
    act_out = perobj[:, LANE:LANE + A].reshape(B, M, A)
    non_exist_out = glob[:, 2 * LANE:2 * LANE + C]                 # (B, C)

    # ---- per-(object, action) slot bookkeeping (training path) ----
    exp_objmask = jnp.repeat(objmask, A, axis=1)                   # (B, K)
    pred_obj = jnp.argmax(obj_out, axis=-1)                        # (B, M)
    pred_obj_k = jnp.repeat(pred_obj, A, axis=1)                   # (B, K)
    posb_act_idx = jnp.tile(jnp.arange(A), (B, M))                 # (B, K)
    posb_inputs = jnp.repeat(inp, A, axis=1)                       # (B, K, D)

    act_flat = act_out.reshape(B, K)
    pred_act_bool = (jax.nn.sigmoid(act_flat) > thres) & (exp_objmask > 0)
    selected = pred_act_bool & (AAidxs_tgts != -1)                 # (B, K)
    pred_aaidx = jnp.where(selected, AAidxs_tgts, -1)              # (B, K)

    obj_emb = packed['object_lookup'][pred_obj_k]                  # (B, K, E)
    act_emb = packed['action_lookup'][posb_act_idx]                # (B, K, E)
    comp_emb = jnp.concatenate([posb_inputs, obj_emb, act_emb], axis=-1)   # (B, K, F)
    comp_emb_b16 = comp_emb.astype(jnp.bfloat16)    # bf16 MXU operand; halves kernel DMA

    # ---- static all-pairs enumeration + validity / targets / class indices ----
    # TODO(synk): the original packs only the selected permutations with a data-dependent
    # MAX_NUM_PAIRS; that dynamic-shape packing has no static-shape Pallas equivalent, so
    # all K*(K-1) pairs are enumerated and invalid ones are masked / -1-padded.
    pair_i = packed['pair_i']
    pair_j = packed['pair_j']
    pair_valid = selected[:, pair_i] & selected[:, pair_j]         # (B, P)
    aa_i = jnp.where(pair_valid, pred_aaidx[:, pair_i], 0)
    aa_j = jnp.where(pair_valid, pred_aaidx[:, pair_j], 0)
    caidx = jnp.where(pair_valid[..., None],
                      packed['aa_aa_tr_to_caidx'][aa_i, aa_j], -1)         # (B, P, T)
    tr_target = jnp.where(pair_valid[..., None],
                          TR_tgts[:, pair_i, pair_j], -1.0)                # (B, P, T)

    # ---- stage 2: temporal_relation head, gather + matmul fused in one Pallas kernel ----
    if use_pallas:
        pv_pad = jnp.pad(pair_valid, ((0, 0), (0, Pp - P)))
        valid_col = pv_pad.astype(jnp.float32)[..., None]                  # (B, Pp, 1)
        flags = pv_pad.reshape(B, NB, PB).any(axis=-1).astype(jnp.int32)   # (B, NB)
        tr_logit = _pair_logits_pallas(comp_emb_b16, valid_col, flags, packed, meta)
    else:
        ce = comp_emb_b16.astype(jnp.float32)
        w_full = jnp.concatenate([packed['w1'], packed['w2']], axis=0).astype(jnp.float32)
        feat = jnp.concatenate([ce[:, pair_i, :], ce[:, pair_j, :]], axis=-1)
        feat = jnp.where(pair_valid[..., None], feat, -1.0)    # original -1 padding value
        tr_logit = (jnp.dot(feat.reshape(B * P, 2 * F), w_full, precision=hp)
                    + packed['b_pair']).reshape(B, P, T)

    # ---- scatter-max of pair logits into composite-action classes (segment-max) ----
    seg_ids = jnp.where(caidx >= 0, caidx, C).reshape(B, P * T)    # invalid -> bucket C
    flat_lg = tr_logit.reshape(B, P * T)

    def _per_batch(ids, lg):
        mx = jax.ops.segment_max(lg, ids, num_segments=C + 1)
        hits = jax.ops.segment_sum(jnp.ones_like(lg), ids, num_segments=C + 1)
        return mx[:C], hits[:C] > 0

    tr_max, exist = jax.vmap(_per_batch)(seg_ids, flat_lg)
    final_outputs = jnp.where(exist, tr_max, non_exist_out)

    return {
        'final_outputs': final_outputs,
        'TR_logit': tr_logit,
        'TR_target': tr_target,
        'perobj_action': act_out,
        'perobj_object': obj_out,
    }


# ---------------------------------------------------------------------------
if __name__ == "__main__":
    cfg = dict(input_dim=32, num_object=5, num_action=4,
               num_temporal_relations=3, act_threshold=0.5,
               embed_dim=8, num_classes=10)
    B, MAX_OBJS = 2, 4
    K = MAX_OBJS * cfg['num_action']
    T = cfg['num_temporal_relations']

    key = jax.random.PRNGKey(0)
    k_param, k_inp, k_aa, k_tr = jax.random.split(key, 4)

    params = init_params(k_param, cfg)
    # pair_block_rows=120 -> 2 pair blocks per batch at this toy size (exercises the grid,
    # the pl.when block skip and both-TC sharding on v7x).
    packed, meta = pack_params(params, cfg, MAX_OBJS, pair_block_rows=120)

    inp = jax.random.normal(k_inp, (B, MAX_OBJS, cfg['input_dim']), jnp.float32)
    objmask = jnp.array([[1.0, 1.0, 1.0, 0.0],
                         [1.0, 1.0, 0.0, 0.0]], jnp.float32)
    AAidxs_tgts = jax.random.randint(k_aa, (B, K), -1, meta['num_aa'], dtype=jnp.int32)
    TR_tgts = jax.random.bernoulli(k_tr, 0.5, (B, K, K, T)).astype(jnp.float32)

    fwd_pallas = jax.jit(functools.partial(
        edm_task2_forward, cfg=cfg, meta=meta, use_pallas=True))
    fwd_ref = jax.jit(functools.partial(
        edm_task2_forward, cfg=cfg, meta=meta, use_pallas=False))

    out = jax.block_until_ready(fwd_pallas(packed, inp, objmask, AAidxs_tgts, TR_tgts))
    ref = jax.block_until_ready(fwd_ref(packed, inp, objmask, AAidxs_tgts, TR_tgts))

    P = K * (K - 1)
    assert out['final_outputs'].shape == (B, cfg['num_classes'])
    assert out['perobj_object'].shape == (B, MAX_OBJS, cfg['num_object'])
    assert out['perobj_action'].shape == (B, MAX_OBJS, cfg['num_action'])
    assert out['TR_logit'].shape == (B, P, T)
    assert out['TR_target'].shape == (B, P, T)
    for name in ('perobj_object', 'perobj_action', 'TR_logit', 'TR_target', 'final_outputs'):
        assert out[name].shape == ref[name].shape, f"shape mismatch: {name}"
        assert jnp.allclose(out[name], ref[name], atol=2e-3, rtol=2e-3), f"mismatch: {name}"

    print("KERNEL_OK")
</pallas_src>

<mosaic_0001>
module attributes {stable_mosaic.version = 11 : i64} {
  func.func private @main(%arg0: i32) attributes {dimension_semantics = [#tpu.dimension_semantics<core_parallel>], iteration_bounds = array<i64: 2>, tpu.core_type = #tpu.core_type<sc_scalar_subcore>, window_params = []} {
    return
  }
}

module attributes {stable_mosaic.version = 11 : i64} {
  func.func private @main(%arg0: i32) attributes {dimension_semantics = [#tpu.dimension_semantics<core_parallel>], iteration_bounds = array<i64: 2>, tpu.core_type = #tpu.core_type<sc_scalar_subcore>, window_params = []} {
    return
  }
}

module attributes {stable_mosaic.version = 11 : i64} {
  func.func @_heads_kernel(%arg0: memref<2x4x32xf32, #tpu.memory_space<vmem>>, %arg1: memref<8x32xf32, #tpu.memory_space<vmem>>, %arg2: memref<2x4x1xf32, #tpu.memory_space<vmem>>, %arg3: memref<32x384xf32, #tpu.memory_space<vmem>>, %arg4: memref<1x384xf32, #tpu.memory_space<vmem>>, %arg5: memref<8x384xf32, #tpu.memory_space<vmem>>, %arg6: memref<2x384xf32, #tpu.memory_space<vmem>>) attributes {dimension_semantics = [], scalar_prefetch = 0 : i64, scratch_operands = 0 : i64, tpu.core_type = #tpu.core_type<tc>} {
    %c0 = arith.constant 0 : index
    %c0_0 = arith.constant 0 : index
    %0 = vector.load %arg3[%c0, %c0_0] : memref<32x384xf32, #tpu.memory_space<vmem>>, vector<32x384xf32>
    %c0_1 = arith.constant 0 : index
    %c0_2 = arith.constant 0 : index
    %1 = vector.load %arg4[%c0_1, %c0_2] : memref<1x384xf32, #tpu.memory_space<vmem>>, vector<1x384xf32>
    %c0_3 = arith.constant 0 : index
    %c0_4 = arith.constant 0 : index
    %2 = vector.load %arg1[%c0_3, %c0_4] : memref<8x32xf32, #tpu.memory_space<vmem>>, vector<8x32xf32>
    %cst = arith.constant dense<0.000000e+00> : vector<8x384xf32>
    %3 = tpu.matmul %2, %0, %cst {dimension_numbers = #tpu.dot_dimension_numbers<[1], [0], [0], [1], [0, 0, 1, 1], [], []>} : vector<8x32xf32>, vector<32x384xf32>, vector<8x384xf32> -> vector<8x384xf32>
    %4 = vector.broadcast %1 : vector<1x384xf32> to vector<8x384xf32>
    %5 = arith.addf %3, %4 : vector<8x384xf32>
    %c0_5 = arith.constant 0 : index
    %c0_6 = arith.constant 0 : index
    %6 = vector.load %arg5[%c0_5, %c0_6] : memref<8x384xf32, #tpu.memory_space<vmem>>, vector<8x384xf32>
    tpu.vector_store %arg5[%c0_5, %c0_6], %5 {strides = array<i32>} : memref<8x384xf32, #tpu.memory_space<vmem>>, vector<8x384xf32>,
    %c0_7 = arith.constant 0 : index
    %c0_8 = arith.constant 0 : index
    %c0_9 = arith.constant 0 : index
    %7 = vector.load %arg0[%c0_7, %c0_8, %c0_9] : memref<2x4x32xf32, #tpu.memory_space<vmem>>, vector<2x4x32xf32>
    %c0_10 = arith.constant 0 : index
    %c0_11 = arith.constant 0 : index
    %c0_12 = arith.constant 0 : index
    %8 = vector.load %arg2[%c0_10, %c0_11, %c0_12] : memref<2x4x1xf32, #tpu.memory_space<vmem>>, vector<2x4x1xf32>
    %cst_13 = arith.constant dense<0.000000e+00> : vector<2x1xf32>
    %9 = vector.multi_reduction <add>, %8, %cst_13 [1] : vector<2x4x1xf32> to vector<2x1xf32>
    %cst_14 = arith.constant 1.000000e+00 : f32
    %10 = vector.broadcast %cst_14 : f32 to vector<2x1xf32>
    %11 = arith.maximumf %9, %10 : vector<2x1xf32>
    %12 = vector.broadcast %8 : vector<2x4x1xf32> to vector<2x4x32xf32>
    %13 = arith.mulf %7, %12 : vector<2x4x32xf32>
    %cst_15 = arith.constant dense<0.000000e+00> : vector<2x32xf32>
    %14 = vector.multi_reduction <add>, %13, %cst_15 [1] : vector<2x4x32xf32> to vector<2x32xf32>
    %15 = vector.broadcast %11 : vector<2x1xf32> to vector<2x32xf32>
    %16 = arith.divf %14, %15 : vector<2x32xf32>
    %cst_16 = arith.constant dense<0.000000e+00> : vector<2x384xf32>
    %17 = tpu.matmul %16, %0, %cst_16 {dimension_numbers = #tpu.dot_dimension_numbers<[1], [0], [0], [1], [0, 0, 1, 1], [], []>} : vector<2x32xf32>, vector<32x384xf32>, vector<2x384xf32> -> vector<2x384xf32>
    %18 = vector.broadcast %1 : vector<1x384xf32> to vector<2x384xf32>
    %19 = arith.addf %17, %18 : vector<2x384xf32>
    %c0_17 = arith.constant 0 : index
    %c0_18 = arith.constant 0 : index
    %20 = vector.load %arg6[%c0_17, %c0_18] : memref<2x384xf32, #tpu.memory_space<vmem>>, vector<2x384xf32>
    tpu.vector_store %arg6[%c0_17, %c0_18], %19 {strides = array<i32>} : memref<2x384xf32, #tpu.memory_space<vmem>>, vector<2x384xf32>,
    return
  }
}

module attributes {stable_mosaic.version = 11 : i64} {
  func.func @_pair_kernel(%arg0: i32, %arg1: i32, %arg2: memref<2x2xi32, #tpu.memory_space<smem>>, %arg3: memref<1x16x48xbf16, #tpu.memory_space<vmem>>, %arg4: memref<120x16xbf16, #tpu.memory_space<vmem>>, %arg5: memref<120x16xbf16, #tpu.memory_space<vmem>>, %arg6: memref<48x3xbf16, #tpu.memory_space<vmem>>, %arg7: memref<48x3xbf16, #tpu.memory_space<vmem>>, %arg8: memref<1x3xf32, #tpu.memory_space<vmem>>, %arg9: memref<1x3xf32, #tpu.memory_space<vmem>>, %arg10: memref<1x120x1xf32, #tpu.memory_space<vmem>>, %arg11: memref<1x120x3xf32, #tpu.memory_space<vmem>>) attributes {dimension_semantics = [#tpu.dimension_semantics<parallel>, #tpu.dimension_semantics<parallel>], iteration_bounds = array<i64: 2, 2>, scalar_prefetch = 1 : i64, scratch_operands = 0 : i64, tpu.core_type = #tpu.core_type<tc>, window_params = [{transform_indices = @transform_0, window_bounds = array<i64: 1, 16, 48>}, {transform_indices = @transform_1, window_bounds = array<i64: 120, 16>}, {transform_indices = @transform_2, window_bounds = array<i64: 120, 16>}, {pipeline_mode = #tpu.pipeline_mode<synchronous>, transform_indices = @transform_3, window_bounds = array<i64: 48, 3>}, {pipeline_mode = #tpu.pipeline_mode<synchronous>, transform_indices = @transform_4, window_bounds = array<i64: 48, 3>}, {pipeline_mode = #tpu.pipeline_mode<synchronous>, transform_indices = @transform_5, window_bounds = array<i64: 1, 3>}, {pipeline_mode = #tpu.pipeline_mode<synchronous>, transform_indices = @transform_6, window_bounds = array<i64: 1, 3>}, {transform_indices = @transform_7, window_bounds = array<i64: 1, 120, 1>}, {transform_indices = @transform_8, window_bounds = array<i64: 1, 120, 3>}]} {
    %c0 = arith.constant 0 : index
    %c0_0 = arith.constant 0 : index
    %0 = vector.load %arg9[%c0, %c0_0] : memref<1x3xf32, #tpu.memory_space<vmem>>, vector<1x3xf32>
    %1 = arith.index_cast %arg0 : i32 to index
    %2 = arith.index_cast %arg1 : i32 to index
    %3 = memref.load %arg2[%1, %2] : memref<2x2xi32, #tpu.memory_space<smem>>
    %c0_i32 = arith.constant 0 : i32
    %4 = arith.cmpi eq, %3, %c0_i32 : i32
    %5 = arith.extui %4 : i1 to i32
    %c0_i32_1 = arith.constant 0 : i32
    %6 = arith.cmpi ne, %5, %c0_i32_1 : i32
    scf.if %6 {
      %13 = vector.shape_cast %0 : vector<1x3xf32> to vector<1x3xf32>
      %14 = vector.broadcast %13 : vector<1x3xf32> to vector<120x3xf32>
      %c0_4 = arith.constant 0 : index
      %c0_5 = arith.constant 0 : index
      %c0_6 = arith.constant 0 : index
      %15 = vector.load %arg11[%c0_4, %c0_5, %c0_6] : memref<1x120x3xf32, #tpu.memory_space<vmem>>, vector<1x120x3xf32>
      %16 = vector.shape_cast %15 : vector<1x120x3xf32> to vector<120x3xf32>
      %17 = vector.shape_cast %14 : vector<120x3xf32> to vector<1x120x3xf32>
      tpu.vector_store %arg11[%c0_4, %c0_5, %c0_6], %17 {strides = array<i32>} : memref<1x120x3xf32, #tpu.memory_space<vmem>>, vector<1x120x3xf32>,
    } else {
    }
    %7 = arith.index_cast %arg0 : i32 to index
    %8 = arith.index_cast %arg1 : i32 to index
    %9 = memref.load %arg2[%7, %8] : memref<2x2xi32, #tpu.memory_space<smem>>
    %c0_i32_2 = arith.constant 0 : i32
    %10 = arith.cmpi ne, %9, %c0_i32_2 : i32
    %11 = arith.extui %10 : i1 to i32
    %c0_i32_3 = arith.constant 0 : i32
    %12 = arith.cmpi ne, %11, %c0_i32_3 : i32
    scf.if %12 {
      %c0_4 = arith.constant 0 : index
      %c0_5 = arith.constant 0 : index
      %c0_6 = arith.constant 0 : index
      %13 = vector.load %arg3[%c0_4, %c0_5, %c0_6] : memref<1x16x48xbf16, #tpu.memory_space<vmem>>, vector<1x16x48xbf16>
      %14 = vector.shape_cast %13 : vector<1x16x48xbf16> to vector<16x48xbf16>
      %c0_7 = arith.constant 0 : index
      %c0_8 = arith.constant 0 : index
      %15 = vector.load %arg6[%c0_7, %c0_8] : memref<48x3xbf16, #tpu.memory_space<vmem>>, vector<48x3xbf16>
      %cst = arith.constant dense<0.000000e+00> : vector<16x3xf32>
      %16 = tpu.matmul %14, %15, %cst {dimension_numbers = #tpu.dot_dimension_numbers<[1], [0], [0], [1], [0, 0, 1, 1], [], []>} : vector<16x48xbf16>, vector<48x3xbf16>, vector<16x3xf32> -> vector<16x3xf32>
      %c0_9 = arith.constant 0 : index
      %c0_10 = arith.constant 0 : index
      %17 = vector.load %arg7[%c0_9, %c0_10] : memref<48x3xbf16, #tpu.memory_space<vmem>>, vector<48x3xbf16>
      %cst_11 = arith.constant dense<0.000000e+00> : vector<16x3xf32>
      %18 = tpu.matmul %14, %17, %cst_11 {dimension_numbers = #tpu.dot_dimension_numbers<[1], [0], [0], [1], [0, 0, 1, 1], [], []>} : vector<16x48xbf16>, vector<48x3xbf16>, vector<16x3xf32> -> vector<16x3xf32>
      %c0_12 = arith.constant 0 : index
      %c0_13 = arith.constant 0 : index
      %19 = vector.load %arg4[%c0_12, %c0_13] : memref<120x16xbf16, #tpu.memory_space<vmem>>, vector<120x16xbf16>
      %20 = arith.extf %19 : vector<120x16xbf16> to vector<120x16xf32>
      %c0_14 = arith.constant 0 : index
      %c0_15 = arith.constant 0 : index
      %21 = vector.load %arg5[%c0_14, %c0_15] : memref<120x16xbf16, #tpu.memory_space<vmem>>, vector<120x16xbf16>
      %22 = arith.extf %21 : vector<120x16xbf16> to vector<120x16xf32>
      %cst_16 = arith.constant dense<0.000000e+00> : vector<120x3xf32>
      %23 = tpu.matmul %20, %16, %cst_16 {dimension_numbers = #tpu.dot_dimension_numbers<[1], [0], [0], [1], [0, 0, 1, 1], [], []>} : vector<120x16xf32>, vector<16x3xf32>, vector<120x3xf32> -> vector<120x3xf32>
      %cst_17 = arith.constant dense<0.000000e+00> : vector<120x3xf32>
      %24 = tpu.matmul %22, %18, %cst_17 {dimension_numbers = #tpu.dot_dimension_numbers<[1], [0], [0], [1], [0, 0, 1, 1], [], []>} : vector<120x16xf32>, vector<16x3xf32>, vector<120x3xf32> -> vector<120x3xf32>
      %25 = arith.addf %23, %24 : vector<120x3xf32>
      %c0_18 = arith.constant 0 : index
      %c0_19 = arith.constant 0 : index
      %26 = vector.load %arg8[%c0_18, %c0_19] : memref<1x3xf32, #tpu.memory_space<vmem>>, vector<1x3xf32>
      %27 = vector.broadcast %26 : vector<1x3xf32> to vector<120x3xf32>
      %28 = arith.addf %25, %27 : vector<120x3xf32>
      %c0_20 = arith.constant 0 : index
      %c0_21 = arith.constant 0 : index
      %c0_22 = arith.constant 0 : index
      %29 = vector.load %arg10[%c0_20, %c0_21, %c0_22] : memref<1x120x1xf32, #tpu.memory_space<vmem>>, vector<1x120x1xf32>
      %30 = vector.shape_cast %29 : vector<1x120x1xf32> to vector<120x1xf32>
      %cst_23 = arith.constant 5.000000e-01 : f32
      %31 = vector.broadcast %cst_23 : f32 to vector<120x1xf32>
      %32 = arith.cmpf ogt, %30, %31 : vector<120x1xf32>
      %33 = vector.shape_cast %32 : vector<120x1xi1> to vector<120x1xi1>
      %34 = vector.broadcast %33 : vector<120x1xi1> to vector<120x3xi1>
      %35 = vector.shape_cast %0 : vector<1x3xf32> to vector<1x3xf32>
      %36 = vector.broadcast %35 : vector<1x3xf32> to vector<120x3xf32>
      %37 = arith.select %34, %28, %36 : vector<120x3xi1>, vector<120x3xf32>
      %c0_24 = arith.constant 0 : index
      %c0_25 = arith.constant 0 : index
      %c0_26 = arith.constant 0 : index
      %38 = vector.load %arg11[%c0_24, %c0_25, %c0_26] : memref<1x120x3xf32, #tpu.memory_space<vmem>>, vector<1x120x3xf32>
      %39 = vector.shape_cast %38 : vector<1x120x3xf32> to vector<120x3xf32>
      %40 = vector.shape_cast %37 : vector<120x3xf32> to vector<1x120x3xf32>
      tpu.vector_store %arg11[%c0_24, %c0_25, %c0_26], %40 {strides = array<i32>} : memref<1x120x3xf32, #tpu.memory_space<vmem>>, vector<1x120x3xf32>,
    } else {
    }
    return
  }
  func.func @transform_0(%arg0: i32, %arg1: i32, %arg2: memref<2x2xi32, #tpu.memory_space<smem>>) -> (i32, i32, i32) {
    %c0_i32 = arith.constant 0 : i32
    %c0_i32_0 = arith.constant 0 : i32
    %c0_i32_1 = arith.constant 0 : i32
    return %arg0, %c0_i32, %c0_i32_0 : i32, i32, i32
  }
  func.func @transform_1(%arg0: i32, %arg1: i32, %arg2: memref<2x2xi32, #tpu.memory_space<smem>>) -> (i32, i32) {
    %c0_i32 = arith.constant 0 : i32
    %c0_i32_0 = arith.constant 0 : i32
    return %arg1, %c0_i32 : i32, i32
  }
  func.func @transform_2(%arg0: i32, %arg1: i32, %arg2: memref<2x2xi32, #tpu.memory_space<smem>>) -> (i32, i32) {
    %c0_i32 = arith.constant 0 : i32
    %c0_i32_0 = arith.constant 0 : i32
    return %arg1, %c0_i32 : i32, i32
  }
  func.func @transform_3(%arg0: i32, %arg1: i32, %arg2: memref<2x2xi32, #tpu.memory_space<smem>>) -> (i32, i32) {
    %c0_i32 = arith.constant 0 : i32
    %c0_i32_0 = arith.constant 0 : i32
    %c0_i32_1 = arith.constant 0 : i32
    return %c0_i32, %c0_i32_0 : i32, i32
  }
  func.func @transform_4(%arg0: i32, %arg1: i32, %arg2: memref<2x2xi32, #tpu.memory_space<smem>>) -> (i32, i32) {
    %c0_i32 = arith.constant 0 : i32
    %c0_i32_0 = arith.constant 0 : i32
    %c0_i32_1 = arith.constant 0 : i32
    return %c0_i32, %c0_i32_0 : i32, i32
  }
  func.func @transform_5(%arg0: i32, %arg1: i32, %arg2: memref<2x2xi32, #tpu.memory_space<smem>>) -> (i32, i32) {
    %c0_i32 = arith.constant 0 : i32
    %c0_i32_0 = arith.constant 0 : i32
    %c0_i32_1 = arith.constant 0 : i32
    return %c0_i32, %c0_i32_0 : i32, i32
  }
  func.func @transform_6(%arg0: i32, %arg1: i32, %arg2: memref<2x2xi32, #tpu.memory_space<smem>>) -> (i32, i32) {
    %c0_i32 = arith.constant 0 : i32
    %c0_i32_0 = arith.constant 0 : i32
    %c0_i32_1 = arith.constant 0 : i32
    return %c0_i32, %c0_i32_0 : i32, i32
  }
  func.func @transform_7(%arg0: i32, %arg1: i32, %arg2: memref<2x2xi32, #tpu.memory_space<smem>>) -> (i32, i32, i32) {
    %c0_i32 = arith.constant 0 : i32
    %c0_i32_0 = arith.constant 0 : i32
    return %arg0, %arg1, %c0_i32 : i32, i32, i32
  }
  func.func @transform_8(%arg0: i32, %arg1: i32, %arg2: memref<2x2xi32, #tpu.memory_space<smem>>) -> (i32, i32, i32) {
    %c0_i32 = arith.constant 0 : i32
    %c0_i32_0 = arith.constant 0 : i32
    return %arg0, %arg1, %c0_i32 : i32, i32, i32
  }
}

</mosaic_0001>

<bundles_post_ra>
// kernel: edm_task2_forward.2
= control target key start
LH: loop header
LB: loop body
LE: loop exit
PB: predicated region body
PF: predicated region fallthrough
CT: control target
= control target key end

     0   :  { %12 = vsyncpa [#allocation3], 0  ;;  %s524_s21 = smov [#allocation2]   ;;  %s605_s0 = inlined_call_operand.vmem [shape: f32[2,4,32], index: 0, kind: input, shape index: {}, may-alias: {0,1}]   ;;  %s606_s1 = inlined_call_operand.vmem [shape: f32[8,32], index: 1, kind: input, shape index: {}, may-alias: {0,1}]   ;;  %s607_s2 = inlined_call_operand.vmem [shape: f32[2,4,1], index: 2, kind: input, shape index: {}]   ;;  %s608_s3 = inlined_call_operand.hbm [shape: f32[32,384], index: 3, kind: input, shape index: {}]   ;;  %s609_s4 = inlined_call_operand.vmem [shape: f32[1,384], index: 4, kind: input, shape index: {}]   ;;  %s610_s5 = inlined_call_operand.vmem [shape: f32[8,384], index: 5, kind: output, shape index: {0}]   ;;  %s611_s6 = inlined_call_operand.vmem [shape: f32[2,384], index: 6, kind: output, shape index: {1}]  }
   0x1   :  { %s24_s22 = sshll.u32 %s524_s21, 4  ;;  %s25_s22 = int_to_ptr.vmem [resolvable:$true] %s24_s22 }
   0x2   :  { %s510_s23 = scalar_lea.vmem %s25_s22, 1536  ;;  %p515_p1 = scmp.lt.s32.totalorder %s25_s22, %s25_s22 }
   0x3   :  { %p511_p0 = scmp.ne.s32.totalorder %s25_s22, %s510_s23  ;;  %p516_p2 = scmp.lt.s32.totalorder %s510_s23, %s510_s23 }
   0x5   :  { %p517_p3 = por %p516_p2, %p515_p1 }
   0x7   :  { %p518_p4 = pnand %p517_p3, %p511_p0 }
   0x9   :  { %521 = shalt.err (!%p518_p4)
}
   0xa   :  { %s525_s24 = smov 384   ;;  %s526_s25 = smov 24  }
   0xb   :  { %30 = dma.hbm_to_vmem [thread:$0]  %s608_s3, 1536, %s25_s22, [#allocation3], %s525_s24, %s525_s24, %s526_s25  }
   0xc   :  { %522 = dma.done.wait [#allocation3], 1536  }
   0xd   :  { %523 = vsyncadd [#allocation3], 4294965760  ;;  %v527_v0 = vmov 0   ;;  %vm218_vm0 = vcmask 3072   ;;  %v216_v1 = vld [vmem:[%s607_s2] sm:$0xf]  ;;  %v51_v60 = vlaneseq }
   0xe   :  { %496 = vset.pattern.permute.xlu0 %v527_v0  ;;  %497 = vset.pattern.permute.xlu1 %v527_v0  ;;  %v217_v2 = vld [vmem:[%s607_s2 + $0x4] sm:$0xf]  ;;  %v219_v3 = vsel %vm218_vm0, %v216_v1, 0.0  ;;  %v46_v18 = vld [vmem:[#allocation2 + $0x50] sm:$0xff]  ;;  %v45_v20 = vld [vmem:[#allocation2 + $0x48] sm:$0xff]  ;;  %v528_v23 = vmov 0.0  }
   0xf   :  { %237 = vperm.xlu0 %496, %v216_v1   ;;  %v226_v4 = vsel %vm218_vm0, %v217_v2, 0.0  ;;  %v220_v5 = vrot.slane %v219_v3, 4  ;;  %94 = vmatprep.subr.mxu0 %v46_v18  ;;  %v43_v21 = vld [vmem:[#allocation2 + $0x38] sm:$0xff]  ;;  %v42_v24 = vld [vmem:[#allocation2 + $0x30] sm:$0xff]  ;;  %v40_v25 = vld [vmem:[#allocation2 + $0x20] sm:$0xff]  ;;  %vm66_vm1 = vcmask 261120  }
  0x10   :  { %v227_v6 = vrot.slane %v226_v4, 4  ;;  %v47_v22 = vld [vmem:[#allocation2 + $0x58] sm:$0xff]  ;;  %95 = vmatpush1.msra.mxu0 %v45_v20  ;;  %467 = vmatprep.subr.mxu1 %v528_v23  ;;  %v44_v26 = vld [vmem:[#allocation2 + $0x40] sm:$0xff]  ;;  %v37_v28 = vld [vmem:[#allocation2 + $0x8] sm:$0xff]  ;;  %vm529_vm2 = vmmov 0   ;;  %vm247_vm3 = vcmask 257024  }
  0x11   :  { %v221_v7 = vadd.f32 %v220_v5, %v219_v3  ;;  %96 = vmatprep.subr.mxu0 %v43_v21  ;;  %468 = vmatpush3.msra.mxu1 %v47_v22  ;;  %v39_v27 = vld [vmem:[#allocation2 + $0x18] sm:$0xff]  ;;  %v41_v29 = vld [vmem:[#allocation2 + $0x28] sm:$0xff]  ;;  %v36_v30 = vld [vmem:[#allocation2] sm:$0xff]  ;;  %vm278_vm4 = vcmask 1041409   ;;  %v52_v61 = vshrl.u32 %v51_v60, 7 }
  0x12   :  { %v228_v8 = vadd.f32 %v227_v6, %v226_v4  ;;  %97 = vmatpush1.msra.mxu0 %v42_v24  ;;  %469 = vmatprep.subr.mxu1 %v528_v23  ;;  %v49_v31 = vld [vmem:[%s606_s1] sm:$0xff]  ;;  %v38_v32 = vld [vmem:[#allocation2 + $0x10] sm:$0xff] }
  0x13   :  { %242 = vperm.xlu0 %496, %v217_v2   ;;  %v222_v9 = vrot.slane %v221_v7, 2  ;;  %98 = vmatprep.subr.mxu0 %v40_v25  ;;  %v214_v34 = vld [vmem:[%s605_s0] sm:$0xf]  ;;  %v215_v35 = vld [vmem:[%s605_s0 + $0x4] sm:$0xf]  ;;  %v53_v62 = vsub.s32 0, %v52_v61 }
  0x14   :  { %v229_v10 = vrot.slane %v228_v8, 2  ;;  %470 = vmatpush3.msra.mxu1 %v44_v26  ;;  %99 = vmatpush1.msra.mxu0 %v39_v27  ;;  %v48_v63 = vld [vmem:[%s609_s4] sm:$0x7]  ;;  %v57_v0 = vsub.s32 1, %v52_v61  ;;  %v61_v1 = vsub.s32 2, %v52_v61 }
  0x15   :  { %v223_v12 = vadd.f32 %v222_v9, %v221_v7  ;;  %471 = vmatprep.subr.mxu1 %v528_v23  ;;  %100 = vmatprep.subr.mxu0 %v37_v28  ;;  %v54_v2 = vrot.slane %v48_v63, %v53_v62 }
  0x16   :  { %v230_v11 = vadd.f32 %v229_v10, %v228_v8  ;;  %472 = vmatpush3.msra.mxu1 %v41_v29  ;;  %101 = vmatpush1.msra.mxu0 %v36_v30  ;;  %v58_v3 = vrot.slane %v48_v63, %v57_v0  ;;  %v62_v4 = vrot.slane %v48_v63, %v61_v1 }
  0x17   :  { %v224_v13 = vrot.slane %v223_v12, 1  ;;  %134 = vmatprep.mubr.f32.mxu0 %v528_v23  ;;  %473 = vmatprep.subr.mxu1 %v528_v23 }
  0x18   :  { %v231_v14 = vrot.slane %v230_v11, 1  ;;  %453 = vmatmul.mubr.msk.f32.vlgmr.msra.gmra.mxu0 %vm66_vm1, %v49_v31  ;;  %474 = vmatpush3.msra.mxu1 %v38_v32 }
  0x19   :  { %v225_v15 = vadd.f32 %v224_v13, %v223_v12  ;;  %475 = vmatprep.mubr.msk.f32.mxu1 %vm529_vm2, %v528_v23  ;;  %306 = vmatprep.subr.mxu0 %v46_v18  ;;  %v530_v12 = vmov 1983009808  }
  0x1a   :  { %v232_v16 = vadd.f32 %v231_v14, %v230_v11  ;;  %478 = vmatprep.subr.mxu1 %v528_v23  ;;  %476 = vmatmul.mubr.msk.f32.vlgmr.msra.gmra.mxu1 %vm66_vm1, %v49_v31  ;;  %v428_v13 = vunpack.c.l.s4 %v530_v12 }
  0x1b   :  { %v233_v17 = vmax.f32 %v225_v15, 1.0  ;;  %307 = vmatpush1.msra.mxu0 %v45_v20  ;;  %479 = vmatpush3.msra.mxu1 %v47_v22 }
  0x1c   :  { %v234_v19 = vmax.f32 %v232_v16, 1.0  ;;  %308 = vmatprep.subr.mxu0 %v43_v21  ;;  %480 = vmatprep.subr.mxu1 %v528_v23  ;;  %v429_v14 = vunpack.c.0.s8 %v428_v13 }
  0x1d   :  { %264 = vperm.xlu1 %497, %v233_v17   ;;  %309 = vmatpush1.msra.mxu0 %v42_v24 }
  0x1e   :  { %481 = vmatpush3.msra.mxu1 %v44_v26  ;;  %310 = vmatprep.subr.mxu0 %v40_v25  ;;  %v432_v21 = vsub.s32 %v429_v14, %v52_v61 }
  0x1f   :  { %482 = vmatprep.subr.mxu1 %v528_v23  ;;  %311 = vmatpush1.msra.mxu0 %v39_v27 }
  0x20   :  { %483 = vmatpush3.msra.mxu1 %v41_v29  ;;  %312 = vmatprep.subr.mxu0 %v37_v28 }
  0x21   :  { %269 = vperm.xlu1 %497, %v234_v19   ;;  %484 = vmatprep.subr.mxu1 %v528_v23 }
  0x22   :  { %313 = vmatpush1.msra.mxu0 %v36_v30  ;;  %346 = vmatprep.mubr.f32.mxu0 %v528_v23 }
  0x23   :  { %485 = vmatpush3.msra.mxu1 %v38_v32  ;;  %486 = vmatprep.mubr.msk.f32.mxu1 %vm529_vm2, %v528_v23 }
  0x8a   :  { %v238_v33 = vpop.permute.xlu0 %237 }
  0x8b   :  { %v245_v37 = vmul.f32 %v238_v33, %v214_v34 }
  0x8d   :  { %v248_v39 = vsel %vm247_vm3, %v245_v37, 0.0 }
  0x8e   :  { %v243_v36 = vpop.permute.xlu0 %242  ;;  %v249_v41 = vrot.slane %v248_v39, 4 }
  0x8f   :  { %v246_v38 = vmul.f32 %v243_v36, %v215_v35 }
  0x90   :  { %v250_v44 = vadd.f32 %v249_v41, %v248_v39 }
  0x91   :  { %v255_v40 = vsel %vm247_vm3, %v246_v38, 0.0 }
  0x92   :  { %v256_v42 = vrot.slane %v255_v40, 4  ;;  %v251_v47 = vrot.slane %v250_v44, 2 }
  0x94   :  { %v257_v45 = vadd.f32 %v256_v42, %v255_v40  ;;  %v252_v49 = vadd.f32 %v251_v47, %v250_v44 }
  0x96   :  { %v258_v48 = vrot.slane %v257_v45, 2  ;;  %v253_v51 = vrot.slane %v252_v49, 1 }
  0x98   :  { %v265_v43 = vpop.permute.xlu1 %264  ;;  %v259_v50 = vadd.f32 %v258_v48, %v257_v45  ;;  %v254_v54 = vadd.f32 %v253_v51, %v252_v49 }
  0x99   :  { %498 = vrcp.f32 %v265_v43 }
  0x9a   :  { %v260_v52 = vrot.slane %v259_v50, 1 }
  0x9c   :  { %v270_v46 = vpop.permute.xlu1 %269  ;;  %v261_v55 = vadd.f32 %v260_v52, %v259_v50 }
  0x9d   :  { %500 = vrcp.f32 %v270_v46 }
  0xa6   :  { %v499_v53 = vpop.eup %498 }
  0xa7   :  { %v273_v57 = vmul.f32 %v499_v53, %v254_v54 }
  0xaa   :  { %v501_v56 = vpop.eup %500 }
  0xab   :  { %v275_v58 = vmul.f32 %v501_v56, %v261_v55 }
  0xad   :  { %v279_v59 = vsel %vm278_vm4, %v275_v58, %v273_v57 }
  0xae   :  { %455 = vmatmul.mubr.msk.f32.vlgmr.msra.gmra.mxu0 %vm66_vm1, %v279_v59  ;;  %487 = vmatmul.mubr.msk.f32.vlgmr.msra.gmra.mxu1 %vm66_vm1, %v279_v59 }
  0xd8   :  { %v136_v5 = vpop.f32.mrf.mxu0 }
  0xd9   :  { %v137_v6 = vadd.f32 %v136_v5, %v54_v2 }
  0xda   :  { %v138_v7 = vpop.f32.mrf.mxu0  ;;  %v207_v8 = vpop.f32.mrf.mxu1 }
  0xdb   :  { %211 = vst [vmem:[%s610_s5] sm:$0xff] %v137_v6  ;;  %v139_v9 = vadd.f32 %v138_v7, %v58_v3  ;;  %v208_v10 = vadd.f32 %v207_v8, %v62_v4 }
  0xdc   :  { %v477_v11 = vpop.f32.mrf.mxu1 }
  0xdd   :  { %212 = vst [vmem:[%s610_s5 + $0x8] sm:$0xff] %v139_v9  ;;  %213 = vst [vmem:[%s610_s5 + $0x10] sm:$0xff] %v208_v10 }
 0x16e   :  { %v348_v15 = vpop.f32.mrf.mxu0  ;;  %v419_v16 = vpop.f32.mrf.mxu1 }
 0x16f   :  { %v349_v19 = vadd.f32 %v348_v15, %v54_v2  ;;  %v420_v20 = vadd.f32 %v419_v16, %v62_v4 }
 0x170   :  { %v350_v17 = vpop.f32.mrf.mxu0  ;;  %v488_v18 = vpop.f32.mrf.mxu1 }
 0x171   :  { %v351_v22 = vadd.f32 %v350_v17, %v58_v3  ;;  %v440_v24 = vrot.slane %v420_v20, %v432_v21 }
 0x173   :  { %v426_v23 = vcombine.low %v349_v19, %v351_v22 }
 0x175   :  { %v433_v25 = vrot.slane %v426_v23, %v432_v21 }
 0x177   :  { %v441_v26 = vcombine.low %v433_v25, %v440_v24 }
 0x179   :  { %443 = vst [vmem:[%s611_s6] sm:$0x3f] %v441_v26 }
 0x17a   :  { %452 = vsyncpa [#allocation3], 1 }

// kernel: edm_task2_forward.3
= control target key start
LH: loop header
LB: loop body
LE: loop exit
PB: predicated region body
PF: predicated region fallthrough
CT: control target
= control target key end

     0   :  { %s2106_s0 = inlined_call_operand.vmem [shape: s32[2,2], index: 0, kind: input, shape index: {}]   ;;  %s2107_s1 = inlined_call_operand.vmem [shape: bf16[2,16,48], index: 1, kind: input, shape index: {}]   ;;  %s2108_s2 = inlined_call_operand.vmem [shape: bf16[240,16], index: 2, kind: input, shape index: {}]   ;;  %s2109_s3 = inlined_call_operand.vmem [shape: bf16[240,16], index: 3, kind: input, shape index: {}]   ;;  %s2110_s4 = inlined_call_operand.vmem [shape: bf16[48,3], index: 4, kind: input, shape index: {}]   ;;  %s2111_s5 = inlined_call_operand.vmem [shape: bf16[48,3], index: 5, kind: input, shape index: {}]   ;;  %s2112_s6 = inlined_call_operand.vmem [shape: f32[1,3], index: 6, kind: input, shape index: {}]   ;;  %s2113_s7 = inlined_call_operand.vmem [shape: f32[1,3], index: 7, kind: input, shape index: {}]   ;;  %s2114_s8 = inlined_call_operand.vmem [shape: f32[2,240,1], index: 8, kind: input, shape index: {}]   ;;  %s2115_s9 = inlined_call_operand.vmem [shape: f32[2,240,3], index: 9, kind: output, shape index: {}]  }
   0x1   :  { %2116 = sst [smem:[#allocation5_spill]] %s2107_s1  ;;  %s14_s11 = sshll.u32 %s2106_s0, 4  ;;  %s15_s11 = int_to_ptr.vmem [resolvable:$true] %s14_s11 }
   0x2   :  { %2117 = sst [smem:[#allocation6_spill]] %s2113_s7  ;;  %s1658_s12 = scalar_lea.vmem %s15_s11, 32 }
   0x3   :  { %p1659_p0 = scmp.ne.s32.totalorder %s15_s11, %s1658_s12  ;;  %p1663_p1 = scmp.lt.s32.totalorder %s15_s11, %s15_s11 }
   0x4   :  { %p1664_p2 = scmp.lt.s32.totalorder %s1658_s12, %s1658_s12 }
   0x6   :  { %p1665_p3 = por %p1664_p2, %p1663_p1 }
   0x8   :  { %p1666_p4 = pnand %p1665_p3, %p1659_p0 }
   0xa   :  { %1669 = shalt.err (!%p1666_p4)  }
   0xb   :  { %s1712_s13 = smov [#allocation3]  }
   0xc   :  { %17 = dma.vmem_to_smem %s15_s11, 32, %s1712_s13, [#allocation2] }
   0xd   :  { %1690 = dma.done.wait [#allocation2], 32 }
   0xe   :  { %1691 = vsyncadd [#allocation2], 4294967264 }
   0xf   :  { %19 = sfence }
  0x10   :  { %s1769_s14 = smov 0   ;;  %s1771_s15 = smov 0  }
  0x11   :  { %s1773_s16 = smov 0   ;;  %s1775_s0 = smov 0  }
  0x12   :  { %s1777_s17 = smov 0  }
  0x13 LB: > { %s34_s18 = sadd.s32 1, %s1702_s16  ;;  %s37_s19 = sadd.s32 1, %s1706_s0  ;;  %s1710_s17 = sphi %s1777_s17, %s25_s17   ;;  %s1706_s0 = sphi %s1775_s0, %s2123_s0   ;;  %s1702_s16 = sphi %s1773_s16, %s2122_s16   ;;  %s1698_s15 = sphi %s1771_s15, %s2121_s15   ;;  %s1694_s14 = sphi %s1769_s14, %s2120_s14  }
  0x14   : > { %p35_p5 = scmp.ge.s32.totalorder %s34_s18, 2  ;;  %p1323_p6 = scmp.ge.s32.totalorder %s1710_s17, 1 }
  0x15   : > { %p322_p7 = scmp.lt.s32.totalorder %s1710_s17, 5 }
  0x16   : > { %s2125_s18 = smov (%p35_p5, %s34_s18), 0  ;;  %s2127_s19 = smov (!%p35_p5, %s37_s19), %s1706_s0 }
  0x17   : > { %p323_p8 = pnand %p1323_p6, %p322_p7  ;;  %p39_p9 = scmp.ge.s32.totalorder %s2127_s19, 2 }
  0x18   : > { %p379_p10 = scmp.lt.s32.totalorder (!%p323_p8), %s1698_s15, 1  ;;  %s384_s20 = smul.u32 (!%p323_p8), 15, %s1694_s14 }
  0x19   : > { %s2129_s19 = smov (%p39_p9, %s2127_s19), 0  ;;  %326 = sbr.rel (%p323_p8) target bundleno = 547 (0x223), region = 52 }
  0x1a   : > { %s2118_s7 = sld [smem:[#allocation6_spill]] (!%p323_p8)  ;;  %s418_s23 = sshra.s32 (!%p323_p8), %s1694_s14, 7 }
  0x1b   : > { %s423_s24 = sand.u32 (!%p323_p8), 127, %s1694_s14  ;;  %p385_p11 = scmp.lt.s32.totalorder (!%p323_p8), %s384_s20, 29 }
  0x1c   : > { %s420_s26 = sadd.s32 (!%p323_p8), %s1698_s15, %s418_s23  ;;  %s2119_s1 = sld [smem:[#allocation5_spill]] (!%p323_p8) }
  0x1d   : > { %s1330_s11 = sshll.u32 (!%p323_p8), %s420_s26, 7 }
  0x1e   : > { %s380_s25 = scalar_select %p379_p10, %s1698_s15, 1 }
  0x1f   : > { %s2131_s20 = smov (!%p385_p11, %s384_s20), 29  ;;  %s1814_s12 = sadd.s32 %s1330_s11, %s423_s24 }
  0x20   : > { %v1805_v0 = vld [vmem:[%s2118_s7] sm:$0x1]  ;;  %s1375_s27 = sshll.u32 %s380_s25, 3  ;;  %s1604_s28 = smul.u32 30, %s380_s25 }
  0x21   : > { %s1326_s13 = sshll.u32 %s2131_s20, 2 }
  0x22   : > { %s1812_s10 = scalar_lea.vmem %s2119_s1, %s1375_s27  ;;  %s402_s21 = sadd.s32 %s1604_s28, %s2131_s20 }
  0x23   : > { %s1819_s14 = scalar_lea.vmem %s2108_s2, %s1326_s13  ;;  %s1824_s25 = scalar_lea.vmem %s2109_s3, %s1326_s13 }
  0x24   : > { %s1328_s29 = sshll.u32 %s402_s21, 3  ;;  %s425_s27 = sld [smem:[#allocation3 + %s1814_s12]] }
  0x25   : > { %s1830_s24 = scalar_lea.vmem %s2114_s8, %s1328_s29  ;;  %s1835_s20 = scalar_lea.vmem %s2115_s9, %s1328_s29 }
  0x2a   : > { %p1331_p12 = scmp.ne.s32.totalorder %s425_s27, 0 }
  0x2c   : > { %429 = sbr.rel (%p1331_p12) target bundleno = 65 (0x41), region = 56 }
  0x31   : > { %v431_v1 = vlaneseq  ;;  %vm436_vm0 = vcmask 23552  }
  0x33   : > { %v432_v2 = vshrl.u32 %v431_v1, 7 }
  0x35   : > { %v433_v3 = vsub.s32 0, %v432_v2 }
  0x37   : > { %v434_v4 = vrot.slane %v1805_v0, %v433_v3 }
  0x39   : > { %437 = vst.msk [vmem:[%s1835_s20] sm:$0xff] %vm436_vm0, %v434_v4  ;;  %438 = vst.msk [vmem:[%s1835_s20 + $0x8] sm:$0xff] %vm436_vm0, %v434_v4 }
  0x3a   : > { %439 = vst.msk [vmem:[%s1835_s20 + $0x10] sm:$0xff] %vm436_vm0, %v434_v4  ;;  %440 = vst.msk [vmem:[%s1835_s20 + $0x18] sm:$0xff] %vm436_vm0, %v434_v4 }
  0x3b   : > { %441 = vst.msk [vmem:[%s1835_s20 + $0x20] sm:$0xff] %vm436_vm0, %v434_v4  ;;  %442 = vst.msk [vmem:[%s1835_s20 + $0x28] sm:$0xff] %vm436_vm0, %v434_v4 }
  0x3c   : > { %443 = vst.msk [vmem:[%s1835_s20 + $0x30] sm:$0xff] %vm436_vm0, %v434_v4  ;;  %444 = vst.msk [vmem:[%s1835_s20 + $0x38] sm:$0xff] %vm436_vm0, %v434_v4 }
  0x3d   : > { %445 = vst.msk [vmem:[%s1835_s20 + $0x40] sm:$0xff] %vm436_vm0, %v434_v4  ;;  %446 = vst.msk [vmem:[%s1835_s20 + $0x48] sm:$0xff] %vm436_vm0, %v434_v4 }
  0x3e   : > { %447 = vst.msk [vmem:[%s1835_s20 + $0x50] sm:$0xff] %vm436_vm0, %v434_v4  ;;  %448 = vst.msk [vmem:[%s1835_s20 + $0x58] sm:$0xff] %vm436_vm0, %v434_v4 }
  0x3f   : > { %449 = vst.msk [vmem:[%s1835_s20 + $0x60] sm:$0xff] %vm436_vm0, %v434_v4  ;;  %450 = vst.msk [vmem:[%s1835_s20 + $0x68] sm:$0xff] %vm436_vm0, %v434_v4 }
  0x40   : > { %451 = vst.msk [vmem:[%s1835_s20 + $0x70] sm:$0xff] %vm436_vm0, %v434_v4 }
  0x41 PF: > { %s452_s1 = sld [smem:[#allocation3 + %s1814_s12]] }
  0x47   : > { %p1332_p13 = scmp.eq.s32.totalorder %s452_s1, 0 }
  0x49   : > { %456 = sbr.rel (%p1332_p13) target bundleno = 547 (0x223), region = 60 }
  0x4e   : > { %v1651_v5 = vld [vmem:[%s2110_s4 + $0x10] sm:$0xff]   ;;  %v1713_v6 = vmov 0.0   ;;  %v1653_v8 = vld [vmem:[%s2110_s4 + $0x8] sm:$0xff]   ;;  %vm1714_vm1 = vmmov 0   ;;  %v1655_v10 = vld [vmem:[%s2110_s4] sm:$0xff]   ;;  %vm488_vm2 = vcmask 392192  }
  0x4f   : > { %1486 = vmatprep.subr.bf16.mxu0 %v1713_v6  ;;  %1496 = vmatprep.subr.bf16.mxu1 %v1713_v6  ;;  %v1652_v7 = vld [vmem:[%s2111_s5 + $0x10] sm:$0xff]   ;;  %v1654_v9 = vld [vmem:[%s2111_s5 + $0x8] sm:$0xff]   ;;  %v1656_v11 = vld [vmem:[%s2111_s5] sm:$0xff]   ;;  %v1715_v16 = vmov 0  }
  0x50   : > { %1487 = vmatpush3.bf16.msra.mxu0 %v1651_v5  ;;  %1492 = vmatprep.mubr.msk.bf16.mxu0 %vm1714_vm1, %v1713_v6  ;;  %v1657_v12 = vld [vmem:[%s1812_s10] sm:$0xff]   ;;  %v1052_v14 = vld [vmem:[%s1830_s24 + $0x8] sm:$0xff]  ;;  %v1053_v15 = vld [vmem:[%s1830_s24 + $0x10] sm:$0xff] }
  0x51   : > { %1497 = vmatpush3.bf16.msra.mxu1 %v1652_v7  ;;  %1488 = vmatprep.subr.bf16.mxu0 %v1713_v6  ;;  %v1051_v13 = vld [vmem:[%s1830_s24] sm:$0xff]  ;;  %vm1067_vm4 = vcmp.gt.f32.partialorder %v1052_v14, 0.5  ;;  %vm1068_vm5 = vcmp.gt.f32.partialorder %v1053_v15, 0.5  ;;  %v1054_v17 = vld [vmem:[%s1830_s24 + $0x18] sm:$0xff]  ;;  %v1056_v21 = vld [vmem:[%s1830_s24 + $0x28] sm:$0xff] }
  0x52   : > { %1498 = vmatprep.subr.bf16.mxu1 %v1713_v6  ;;  %1502 = vmatprep.mubr.msk.bf16.mxu1 %vm1714_vm1, %v1713_v6  ;;  %vm1066_vm3 = vcmp.gt.f32.partialorder %v1051_v13, 0.5  ;;  %v1083_v19 = vsel %vm1068_vm5, 1, %v1715_v16  ;;  %v1055_v20 = vld [vmem:[%s1830_s24 + $0x20] sm:$0xff]  ;;  %vm1069_vm6 = vcmp.gt.f32.partialorder %v1054_v17, 0.5  ;;  %v1082_v22 = vsel %vm1067_vm4, 1, %v1715_v16  ;;  %v1057_v24 = vld [vmem:[%s1830_s24 + $0x30] sm:$0xff] }
  0x53   : > { %1649 = vset.pattern.permute.xlu0 %v1715_v16  ;;  %1650 = vset.pattern.permute.xlu1 %v1715_v16  ;;  %v1081_v18 = vsel %vm1066_vm3, 1, %v1715_v16  ;;  %v1084_v23 = vsel %vm1069_vm6, 1, %v1715_v16  ;;  %vm1070_vm7 = vcmp.gt.f32.partialorder %v1055_v20, 0.5  ;;  %vm1071_vm8 = vcmp.gt.f32.partialorder %v1056_v21, 0.5  ;;  %v1058_v25 = vld [vmem:[%s1830_s24 + $0x38] sm:$0xff]  ;;  %v1059_v28 = vld [vmem:[%s1830_s24 + $0x40] sm:$0xff] }
  0x54   : > { %1489 = vmatpush3.bf16.msra.mxu0 %v1653_v8  ;;  %1097 = vperm.xlu0 %1649, %v1081_v18   ;;  %v1085_v26 = vsel %vm1070_vm7, 1, %v1715_v16  ;;  %v1086_v27 = vsel %vm1071_vm8, 1, %v1715_v16  ;;  %vm1072_vm9 = vcmp.gt.f32.partialorder %v1057_v24, 0.5  ;;  %vm1073_vm10 = vcmp.gt.f32.partialorder %v1058_v25, 0.5  ;;  %v1060_v29 = vld [vmem:[%s1830_s24 + $0x48] sm:$0xff]  ;;  %v1061_v32 = vld [vmem:[%s1830_s24 + $0x50] sm:$0xff] }
  0x55   : > { %1499 = vmatpush3.bf16.msra.mxu1 %v1654_v9  ;;  %1490 = vmatprep.subr.bf16.mxu0 %v1713_v6  ;;  %v1087_v30 = vsel %vm1072_vm9, 1, %v1715_v16  ;;  %v1088_v31 = vsel %vm1073_vm10, 1, %v1715_v16  ;;  %vm1074_vm11 = vcmp.gt.f32.partialorder %v1059_v28, 0.5  ;;  %vm1075_vm12 = vcmp.gt.f32.partialorder %v1060_v29, 0.5  ;;  %v1062_v33 = vld [vmem:[%s1830_s24 + $0x58] sm:$0xff]  ;;  %v1063_v36 = vld [vmem:[%s1830_s24 + $0x60] sm:$0xff] }
  0x56   : > { %1500 = vmatprep.subr.bf16.mxu1 %v1713_v6  ;;  %1103 = vperm.xlu1 %1650, %v1083_v19   ;;  %v1089_v34 = vsel %vm1074_vm11, 1, %v1715_v16  ;;  %v1090_v35 = vsel %vm1075_vm12, 1, %v1715_v16  ;;  %vm1076_vm13 = vcmp.gt.f32.partialorder %v1061_v32, 0.5  ;;  %vm1077_vm14 = vcmp.gt.f32.partialorder %v1062_v33, 0.5  ;;  %v1064_v37 = vld [vmem:[%s1830_s24 + $0x68] sm:$0xff]  ;;  %v1065_v40 = vld [vmem:[%s1830_s24 + $0x70] sm:$0xff] }
  0x57   : > { %v1091_v38 = vsel %vm1076_vm13, 1, %v1715_v16  ;;  %v1092_v39 = vsel %vm1077_vm14, 1, %v1715_v16  ;;  %vm1078_vm15 = vcmp.gt.f32.partialorder %v1063_v36, 0.5  ;;  %vm1079_vm0 = vcmp.gt.f32.partialorder %v1064_v37, 0.5  ;;  %v1377_v46 = vld [vmem:[%s1819_s14] sm:$0xff]   ;;  %v1432_v58 = vld [vmem:[%s1819_s14 + $0x8] sm:$0xff]  }
  0x58   : > { %1491 = vmatpush3.bf16.msra.mxu0 %v1655_v10  ;;  %1100 = vperm.xlu0 %1649, %v1082_v22   ;;  %v1093_v41 = vsel %vm1078_vm15, 1, %v1715_v16  ;;  %v1094_v42 = vsel %vm1079_vm0, 1, %v1715_v16  ;;  %v1405_v48 = vld [vmem:[%s1824_s25] sm:$0xff]   ;;  %v1378_v51 = vunpack.c.l.bf16 %v1377_v46  ;;  %vm658_vm3 = vcmask 130048   ;;  %v1438_v59 = vld [vmem:[%s1824_s25 + $0x8] sm:$0xff]   ;;  %v1433_v1 = vld [vmem:[%s1819_s14 + $0x10] sm:$0xff]  }
  0x59   : > { %1501 = vmatpush3.bf16.msra.mxu1 %v1656_v11  ;;  %1506 = vmatprep.subr.mxu0 %v1713_v6  ;;  %v1406_v53 = vunpack.c.l.bf16 %v1405_v48  ;;  %v1379_v56 = vunpack.c.h.bf16 %v1377_v46  ;;  %v1407_v57 = vunpack.c.h.bf16 %v1405_v48  ;;  %v1382_v60 = vunpack.c.l.bf16 %v1432_v58  ;;  %v1439_v2 = vld [vmem:[%s1824_s25 + $0x10] sm:$0xff]   ;;  %v1434_v8 = vld [vmem:[%s1819_s14 + $0x18] sm:$0xff]   ;;  %v1435_v14 = vld [vmem:[%s1819_s14 + $0x20] sm:$0xff]  }
  0x5a   : > { %1555 = vmatprep.subr.mxu1 %v1713_v6  ;;  %1106 = vperm.xlu1 %1650, %v1084_v23   ;;  %v1410_v61 = vunpack.c.l.bf16 %v1438_v59  ;;  %v1383_v62 = vunpack.c.h.bf16 %v1432_v58  ;;  %v1411_v63 = vunpack.c.h.bf16 %v1438_v59  ;;  %v1386_v3 = vunpack.c.l.bf16 %v1433_v1  ;;  %v1440_v9 = vld [vmem:[%s1824_s25 + $0x18] sm:$0xff]   ;;  %v1441_v15 = vld [vmem:[%s1824_s25 + $0x20] sm:$0xff]   ;;  %v1436_v20 = vld [vmem:[%s1819_s14 + $0x28] sm:$0xff]  }
  0x5b   : > { %1493 = vmatmul.mubr.msk.bf16.vlgmr.msra.gmra.mxu0 %vm488_vm2, %v1657_v12  ;;  %v1414_v4 = vunpack.c.l.bf16 %v1439_v2  ;;  %v1387_v5 = vunpack.c.h.bf16 %v1433_v1  ;;  %v1415_v7 = vunpack.c.h.bf16 %v1439_v2  ;;  %v1390_v10 = vunpack.c.l.bf16 %v1434_v8  ;;  %v1442_v21 = vld [vmem:[%s1824_s25 + $0x28] sm:$0xff]   ;;  %v612_v32 = vld [vmem:[%s1819_s14 + $0x38] sm:$0xf] }
  0x5c   : > { %1503 = vmatmul.mubr.msk.bf16.vlgmr.msra.gmra.mxu1 %vm488_vm2, %v1657_v12  ;;  %1510 = vmatprep.mubr.msk.f32.mxu0 %vm1714_vm1, %v1713_v6  ;;  %vm1080_vm2 = vcmp.gt.f32.partialorder %v1065_v40, 0.5  ;;  %v1418_v11 = vunpack.c.l.bf16 %v1440_v9  ;;  %v1391_v12 = vunpack.c.h.bf16 %v1434_v8  ;;  %v1419_v13 = vunpack.c.h.bf16 %v1440_v9  ;;  %v642_v33 = vld [vmem:[%s1824_s25 + $0x38] sm:$0xf] }
  0x5d   : > { %1559 = vmatprep.mubr.msk.f32.mxu1 %vm1714_vm1, %v1713_v6  ;;  %1109 = vperm.xlu0 %1649, %v1085_v26   ;;  %v1095_v43 = vsel %vm1080_vm2, 1, %v1715_v16  ;;  %v1394_v16 = vunpack.c.l.bf16 %v1435_v14  ;;  %v1422_v17 = vunpack.c.l.bf16 %v1441_v15  ;;  %v1395_v18 = vunpack.c.h.bf16 %v1435_v14  ;;  %v1437_v26 = vld [vmem:[%s1819_s14 + $0x30] sm:$0xff]  }
  0x5e   : > { %1112 = vperm.xlu1 %1650, %v1086_v27   ;;  %v1423_v19 = vunpack.c.h.bf16 %v1441_v15  ;;  %v1398_v22 = vunpack.c.l.bf16 %v1436_v20  ;;  %v1426_v23 = vunpack.c.l.bf16 %v1442_v21  ;;  %v1399_v24 = vunpack.c.h.bf16 %v1436_v20  ;;  %v1443_v27 = vld [vmem:[%s1824_s25 + $0x30] sm:$0xff]  }
  0x5f   : > { %v1427_v25 = vunpack.c.h.bf16 %v1442_v21  ;;  %v1402_v28 = vunpack.c.l.bf16 %v1437_v26  ;;  %v1430_v29 = vunpack.c.l.bf16 %v1443_v27  ;;  %v1157_v36 = vlaneseq }
  0x60   : > { %vm1177_vm4 = vcmask 23552  }
  0x61   : > { %1115 = vperm.xlu0 %1649, %v1087_v30   ;;  %v1403_v30 = vunpack.c.h.bf16 %v1437_v26  ;;  %v1158_v37 = vshrl.u32 %v1157_v36, 7 }
  0x62   : > { %1118 = vperm.xlu1 %1650, %v1088_v31   ;;  %v1431_v31 = vunpack.c.h.bf16 %v1443_v27 }
  0x65   : > { %1121 = vperm.xlu0 %1649, %v1089_v34   ;;  %v627_v34 = vunpack.c.l.bf16 %v612_v32 }
  0x66   : > { %1124 = vperm.xlu1 %1650, %v1090_v35   ;;  %v657_v35 = vunpack.c.l.bf16 %v642_v33 }
  0x69   : > { %1127 = vperm.xlu0 %1649, %v1091_v38   ;;  %v1159_v38 = vsub.s32 0, %v1158_v37 }
  0x6a   : > { %1130 = vperm.xlu1 %1650, %v1092_v39  }
  0x6d   : > { %1133 = vperm.xlu0 %1649, %v1093_v41  }
  0x6e   : > { %1136 = vperm.xlu1 %1650, %v1094_v42   ;;  %v2026_v42 = vld [vmem:[%s2112_s6] ss:$0 sm:$0xff] }
  0x71   : > { %1139 = vperm.xlu0 %1649, %v1095_v43  }
  0xcf   : > { %v1098_v39 = vpop.permute.xlu0 %1097 }
  0xd3   : > { %v1101_v48 = vpop.permute.xlu0 %1100 }
  0xd4   : > { %vm1142_vm5 = vcmp.eq.s32.totalorder %v1101_v48, 1 }
 0x11b   : > { %v526_v44 = vpop.f32.mrf.mxu0 }
 0x11c   : > { %v591_v45 = vpop.f32.mrf.mxu1 }
 0x11d   : > { %v1494_v47 = vpop.f32.mrf.mxu0 }
 0x11e   : > { %v1504_v49 = vpop.f32.mrf.mxu1 }
 0x11f   : > { %v529_v50 = vpop.f32.mrf.mxu0 }
 0x120   : > { %v594_v52 = vpop.f32.mrf.mxu1  ;;  %1556 = vmatpush3.msra.mxu1 %v529_v50 }
 0x121   : > { %1507 = vmatpush3.msra.mxu0 %v594_v52  ;;  %v1495_v54 = vpop.f32.mrf.mxu0  ;;  %1557 = vmatprep.subr.mxu1 %v1713_v6 }
 0x122   : > { %v1505_v55 = vpop.f32.mrf.mxu1  ;;  %1508 = vmatprep.subr.mxu0 %v1713_v6  ;;  %1558 = vmatpush3.msra.mxu1 %v526_v44 }
 0x123   : > { %1509 = vmatpush3.msra.mxu0 %v591_v45  ;;  %1560 = vmatmul.mubr.msk.f32.vlgmr.msra.gmra.mxu1 %vm658_vm3, %v1378_v51 }
 0x124   : > { %1511 = vmatmul.mubr.msk.f32.vlgmr.msra.gmra.mxu0 %vm658_vm3, %v1406_v53  ;;  %1562 = vmatprep.mubr.msk.f32.mxu1 %vm1714_vm1, %v1713_v6  ;;  %v1104_v53 = vpop.permute.xlu1 %1103 }
 0x125   : > { %1513 = vmatprep.mubr.msk.f32.mxu0 %vm1714_vm1, %v1713_v6  ;;  %vm1143_vm6 = vcmp.eq.s32.totalorder %v1104_v53, 1 }
 0x127   : > { %1563 = vmatmul.mubr.msk.f32.gmra.mxu1 %vm658_vm3, %v1379_v56 }
 0x128   : > { %1514 = vmatmul.mubr.msk.f32.gmra.mxu0 %vm658_vm3, %v1407_v57  ;;  %1565 = vmatprep.mubr.msk.f32.mxu1 %vm1714_vm1, %v1713_v6 }
 0x129   : > { %1516 = vmatprep.mubr.msk.f32.mxu0 %vm1714_vm1, %v1713_v6 }
 0x12b   : > { %1566 = vmatmul.mubr.msk.f32.gmra.mxu1 %vm658_vm3, %v1382_v60 }
 0x12c   : > { %1517 = vmatmul.mubr.msk.f32.gmra.mxu0 %vm658_vm3, %v1410_v61  ;;  %1568 = vmatprep.mubr.msk.f32.mxu1 %vm1714_vm1, %v1713_v6 }
 0x12d   : > { %1519 = vmatprep.mubr.msk.f32.mxu0 %vm1714_vm1, %v1713_v6 }
 0x12f   : > { %1569 = vmatmul.mubr.msk.f32.gmra.mxu1 %vm658_vm3, %v1383_v62 }
 0x130   : > { %1520 = vmatmul.mubr.msk.f32.gmra.mxu0 %vm658_vm3, %v1411_v63  ;;  %1571 = vmatprep.mubr.msk.f32.mxu1 %vm1714_vm1, %v1713_v6  ;;  %v1107_v63 = vpop.permute.xlu1 %1106 }
 0x131   : > { %1522 = vmatprep.mubr.msk.f32.mxu0 %vm1714_vm1, %v1713_v6  ;;  %vm1144_vm7 = vcmp.eq.s32.totalorder %v1107_v63, 1 }
 0x133   : > { %1572 = vmatmul.mubr.msk.f32.gmra.mxu1 %vm658_vm3, %v1386_v3 }
 0x134   : > { %1523 = vmatmul.mubr.msk.f32.gmra.mxu0 %vm658_vm3, %v1414_v4  ;;  %1574 = vmatprep.mubr.msk.f32.mxu1 %vm1714_vm1, %v1713_v6  ;;  %v1113_v21 = vpop.permute.xlu1 %1112 }
 0x135   : > { %1525 = vmatprep.mubr.msk.f32.mxu0 %vm1714_vm1, %v1713_v6  ;;  %vm1146_vm9 = vcmp.eq.s32.totalorder %v1113_v21, 1 }
 0x137   : > { %1575 = vmatmul.mubr.msk.f32.gmra.mxu1 %vm658_vm3, %v1387_v5 }
 0x138   : > { %1526 = vmatmul.mubr.msk.f32.gmra.mxu0 %vm658_vm3, %v1415_v7  ;;  %1577 = vmatprep.mubr.msk.f32.mxu1 %vm1714_vm1, %v1713_v6 }
 0x139   : > { %1528 = vmatprep.mubr.msk.f32.mxu0 %vm1714_vm1, %v1713_v6 }
 0x13b   : > { %1578 = vmatmul.mubr.msk.f32.gmra.mxu1 %vm658_vm3, %v1390_v10  ;;  %v1110_v10 = vpop.permute.xlu0 %1109 }
 0x13c   : > { %1529 = vmatmul.mubr.msk.f32.gmra.mxu0 %vm658_vm3, %v1418_v11  ;;  %1580 = vmatprep.mubr.msk.f32.mxu1 %vm1714_vm1, %v1713_v6  ;;  %vm1145_vm8 = vcmp.eq.s32.totalorder %v1110_v10, 1 }
 0x13d   : > { %1531 = vmatprep.mubr.msk.f32.mxu0 %vm1714_vm1, %v1713_v6 }
 0x13f   : > { %1581 = vmatmul.mubr.msk.f32.gmra.mxu1 %vm658_vm3, %v1391_v12  ;;  %v1116_v26 = vpop.permute.xlu0 %1115 }
 0x140   : > { %1532 = vmatmul.mubr.msk.f32.gmra.mxu0 %vm658_vm3, %v1419_v13  ;;  %1583 = vmatprep.mubr.msk.f32.mxu1 %vm1714_vm1, %v1713_v6  ;;  %vm1147_vm10 = vcmp.eq.s32.totalorder %v1116_v26, 1 }
 0x141   : > { %1534 = vmatprep.mubr.msk.f32.mxu0 %vm1714_vm1, %v1713_v6 }
 0x143   : > { %1584 = vmatmul.mubr.msk.f32.gmra.mxu1 %vm658_vm3, %v1394_v16 }
 0x144   : > { %1535 = vmatmul.mubr.msk.f32.gmra.mxu0 %vm658_vm3, %v1422_v17  ;;  %1586 = vmatprep.mubr.msk.f32.mxu1 %vm1714_vm1, %v1713_v6 }
 0x145   : > { %1537 = vmatprep.mubr.msk.f32.mxu0 %vm1714_vm1, %v1713_v6 }
 0x147   : > { %1587 = vmatmul.mubr.msk.f32.gmra.mxu1 %vm658_vm3, %v1395_v18 }
 0x148   : > { %1538 = vmatmul.mubr.msk.f32.gmra.mxu0 %vm658_vm3, %v1423_v19  ;;  %1589 = vmatprep.mubr.msk.f32.mxu1 %vm1714_vm1, %v1713_v6 }
 0x149   : > { %1540 = vmatprep.mubr.msk.f32.mxu0 %vm1714_vm1, %v1713_v6 }
 0x14b   : > { %1590 = vmatmul.mubr.msk.f32.gmra.mxu1 %vm658_vm3, %v1398_v22 }
 0x14c   : > { %1541 = vmatmul.mubr.msk.f32.gmra.mxu0 %vm658_vm3, %v1426_v23  ;;  %1592 = vmatprep.mubr.msk.f32.mxu1 %vm1714_vm1, %v1713_v6 }
 0x14d   : > { %1543 = vmatprep.mubr.msk.f32.mxu0 %vm1714_vm1, %v1713_v6 }
 0x14f   : > { %1593 = vmatmul.mubr.msk.f32.gmra.mxu1 %vm658_vm3, %v1399_v24 }
 0x150   : > { %1544 = vmatmul.mubr.msk.f32.gmra.mxu0 %vm658_vm3, %v1427_v25  ;;  %1595 = vmatprep.mubr.msk.f32.mxu1 %vm1714_vm1, %v1713_v6 }
 0x151   : > { %1546 = vmatprep.mubr.msk.f32.mxu0 %vm1714_vm1, %v1713_v6 }
 0x153   : > { %1596 = vmatmul.mubr.msk.f32.gmra.mxu1 %vm658_vm3, %v1402_v28 }
 0x154   : > { %1547 = vmatmul.mubr.msk.f32.gmra.mxu0 %vm658_vm3, %v1430_v29  ;;  %1598 = vmatprep.mubr.msk.f32.mxu1 %vm1714_vm1, %v1713_v6 }
 0x155   : > { %1549 = vmatprep.mubr.msk.f32.mxu0 %vm1714_vm1, %v1713_v6 }
 0x157   : > { %1599 = vmatmul.mubr.msk.f32.gmra.mxu1 %vm658_vm3, %v1403_v30 }
 0x158   : > { %1550 = vmatmul.mubr.msk.f32.gmra.mxu0 %vm658_vm3, %v1431_v31  ;;  %1601 = vmatprep.mubr.msk.f32.mxu1 %vm1714_vm1, %v1713_v6 }
 0x159   : > { %1552 = vmatprep.mubr.msk.f32.mxu0 %vm1714_vm1, %v1713_v6  ;;  %v2029_v6 = vrot.slane %v1805_v0, %v1159_v38  ;;  %vm1141_vm1 = vcmp.eq.s32.totalorder %v1098_v39, 1 }
 0x15b   : > { %1602 = vmatmul.mubr.msk.f32.gmra.mxu1 %vm658_vm3, %v627_v34 }
 0x15c   : > { %1553 = vmatmul.mubr.msk.f32.gmra.mxu0 %vm658_vm3, %v657_v35  ;;  %v1119_v35 = vpop.permute.xlu1 %1118 }
 0x15d   : > { %vm1148_vm11 = vcmp.eq.s32.totalorder %v1119_v35, 1 }
 0x1e3   : > { %v955_v40 = vpop.f32.mrf.mxu1 }
 0x1e4   : > { %v770_v41 = vpop.f32.mrf.mxu0 }
 0x1e5   : > { %v956_v43 = vadd.f32 %v955_v40, %v770_v41  ;;  %v1561_v44 = vpop.f32.mrf.mxu1 }
 0x1e6   : > { %v1512_v45 = vpop.f32.mrf.mxu0 }
 0x1e7   : > { %v1036_v46 = vadd.f32 %v2026_v42, %v956_v43  ;;  %v960_v47 = vpop.f32.mrf.mxu1 }
 0x1e8   : > { %v775_v49 = vpop.f32.mrf.mxu0 }
 0x1e9   : > { %v961_v50 = vadd.f32 %v960_v47, %v775_v49  ;;  %v1564_v51 = vpop.f32.mrf.mxu1  ;;  %v1162_v52 = vsel %vm1141_vm1, %v1036_v46, %v2029_v6  ;;  %v1122_v47 = vpop.permute.xlu0 %1121 }
 0x1ea   : > { %v1515_v54 = vpop.f32.mrf.mxu0  ;;  %1178 = vst.msk [vmem:[%s1835_s20] sm:$0xff] %vm1177_vm4, %v1162_v52  ;;  %vm1149_vm12 = vcmp.eq.s32.totalorder %v1122_v47, 1 }
 0x1eb   : > { %v1037_v0 = vadd.f32 %v2026_v42, %v961_v50  ;;  %v965_v55 = vpop.f32.mrf.mxu1 }
 0x1ec   : > { %v780_v56 = vpop.f32.mrf.mxu0 }
 0x1ed   : > { %v966_v57 = vadd.f32 %v965_v55, %v780_v56  ;;  %v1567_v58 = vpop.f32.mrf.mxu1  ;;  %v1163_v59 = vsel %vm1142_vm5, %v1037_v0, %v2029_v6  ;;  %v1125_v0 = vpop.permute.xlu1 %1124 }
 0x1ee   : > { %v1518_v60 = vpop.f32.mrf.mxu0  ;;  %1179 = vst.msk [vmem:[%s1835_s20 + $0x8] sm:$0xff] %vm1177_vm4, %v1163_v59  ;;  %vm1150_vm13 = vcmp.eq.s32.totalorder %v1125_v0, 1 }
 0x1ef   : > { %v1038_v61 = vadd.f32 %v2026_v42, %v966_v57  ;;  %v970_v62 = vpop.f32.mrf.mxu1 }
 0x1f0   : > { %v785_v1 = vpop.f32.mrf.mxu0 }
 0x1f1   : > { %v971_v2 = vadd.f32 %v970_v62, %v785_v1  ;;  %v1570_v3 = vpop.f32.mrf.mxu1  ;;  %v1164_v4 = vsel %vm1143_vm6, %v1038_v61, %v2029_v6  ;;  %v1128_v62 = vpop.permute.xlu0 %1127 }
 0x1f2   : > { %v1521_v5 = vpop.f32.mrf.mxu0  ;;  %1180 = vst.msk [vmem:[%s1835_s20 + $0x10] sm:$0xff] %vm1177_vm4, %v1164_v4  ;;  %vm1151_vm14 = vcmp.eq.s32.totalorder %v1128_v62, 1 }
 0x1f3   : > { %v1039_v7 = vadd.f32 %v2026_v42, %v971_v2  ;;  %v975_v8 = vpop.f32.mrf.mxu1 }
 0x1f4   : > { %v790_v9 = vpop.f32.mrf.mxu0 }
 0x1f5   : > { %v976_v11 = vadd.f32 %v975_v8, %v790_v9  ;;  %v1573_v12 = vpop.f32.mrf.mxu1  ;;  %v1165_v13 = vsel %vm1144_vm7, %v1039_v7, %v2029_v6  ;;  %v1131_v8 = vpop.permute.xlu1 %1130 }
 0x1f6   : > { %v1524_v14 = vpop.f32.mrf.mxu0  ;;  %1181 = vst.msk [vmem:[%s1835_s20 + $0x18] sm:$0xff] %vm1177_vm4, %v1165_v13  ;;  %vm1152_vm15 = vcmp.eq.s32.totalorder %v1131_v8, 1 }
 0x1f7   : > { %v1040_v15 = vadd.f32 %v2026_v42, %v976_v11  ;;  %v980_v16 = vpop.f32.mrf.mxu1 }
 0x1f8   : > { %v795_v17 = vpop.f32.mrf.mxu0 }
 0x1f9   : > { %v1166_v18 = vsel %vm1145_vm8, %v1040_v15, %v2029_v6  ;;  %v981_v19 = vadd.f32 %v980_v16, %v795_v17  ;;  %v1576_v20 = vpop.f32.mrf.mxu1  ;;  %v1134_v16 = vpop.permute.xlu0 %1133 }
 0x1fa   : > { %1182 = vst.msk [vmem:[%s1835_s20 + $0x20] sm:$0xff] %vm1177_vm4, %v1166_v18  ;;  %v1527_v22 = vpop.f32.mrf.mxu0  ;;  %vm1153_vm0 = vcmp.eq.s32.totalorder %v1134_v16, 1  ;;  %v1137_v20 = vpop.permute.xlu1 %1136 }
 0x1fb   : > { %v1041_v23 = vadd.f32 %v2026_v42, %v981_v19  ;;  %v985_v24 = vpop.f32.mrf.mxu1  ;;  %vm1154_vm2 = vcmp.eq.s32.totalorder %v1137_v20, 1 }
 0x1fc   : > { %v800_v25 = vpop.f32.mrf.mxu0 }
 0x1fd   : > { %v1167_v27 = vsel %vm1146_vm9, %v1041_v23, %v2029_v6  ;;  %v986_v28 = vadd.f32 %v985_v24, %v800_v25  ;;  %v1579_v29 = vpop.f32.mrf.mxu1 }
 0x1fe   : > { %1183 = vst.msk [vmem:[%s1835_s20 + $0x28] sm:$0xff] %vm1177_vm4, %v1167_v27  ;;  %v1530_v30 = vpop.f32.mrf.mxu0 }
 0x1ff   : > { %v1042_v31 = vadd.f32 %v2026_v42, %v986_v28  ;;  %v990_v32 = vpop.f32.mrf.mxu1  ;;  %v1140_v28 = vpop.permute.xlu0 %1139 }
 0x200   : > { %v805_v33 = vpop.f32.mrf.mxu0  ;;  %vm1155_vm3 = vcmp.eq.s32.totalorder %v1140_v28, 1 }
 0x201   : > { %v1168_v34 = vsel %vm1147_vm10, %v1042_v31, %v2029_v6  ;;  %v991_v36 = vadd.f32 %v990_v32, %v805_v33  ;;  %v1582_v37 = vpop.f32.mrf.mxu1 }
 0x202   : > { %1184 = vst.msk [vmem:[%s1835_s20 + $0x30] sm:$0xff] %vm1177_vm4, %v1168_v34  ;;  %v1533_v38 = vpop.f32.mrf.mxu0 }
 0x203   : > { %v1043_v39 = vadd.f32 %v2026_v42, %v991_v36  ;;  %v995_v40 = vpop.f32.mrf.mxu1 }
 0x204   : > { %v810_v41 = vpop.f32.mrf.mxu0 }
 0x205   : > { %v1169_v43 = vsel %vm1148_vm11, %v1043_v39, %v2029_v6  ;;  %v996_v44 = vadd.f32 %v995_v40, %v810_v41  ;;  %v1585_v45 = vpop.f32.mrf.mxu1 }
 0x206   : > { %1185 = vst.msk [vmem:[%s1835_s20 + $0x38] sm:$0xff] %vm1177_vm4, %v1169_v43  ;;  %v1536_v46 = vpop.f32.mrf.mxu0 }
 0x207   : > { %v1044_v48 = vadd.f32 %v2026_v42, %v996_v44  ;;  %v1000_v49 = vpop.f32.mrf.mxu1 }
 0x208   : > { %v815_v50 = vpop.f32.mrf.mxu0 }
 0x209   : > { %v1170_v51 = vsel %vm1149_vm12, %v1044_v48, %v2029_v6  ;;  %v1001_v52 = vadd.f32 %v1000_v49, %v815_v50  ;;  %v1588_v53 = vpop.f32.mrf.mxu1 }
 0x20a   : > { %1186 = vst.msk [vmem:[%s1835_s20 + $0x40] sm:$0xff] %vm1177_vm4, %v1170_v51  ;;  %v1539_v54 = vpop.f32.mrf.mxu0 }
 0x20b   : > { %v1045_v55 = vadd.f32 %v2026_v42, %v1001_v52  ;;  %v1005_v56 = vpop.f32.mrf.mxu1 }
 0x20c   : > { %v820_v57 = vpop.f32.mrf.mxu0 }
 0x20d   : > { %v1171_v58 = vsel %vm1150_vm13, %v1045_v55, %v2029_v6  ;;  %v1006_v59 = vadd.f32 %v1005_v56, %v820_v57  ;;  %v1591_v60 = vpop.f32.mrf.mxu1 }
 0x20e   : > { %1187 = vst.msk [vmem:[%s1835_s20 + $0x48] sm:$0xff] %vm1177_vm4, %v1171_v58  ;;  %v1542_v61 = vpop.f32.mrf.mxu0 }
 0x20f   : > { %v1046_v63 = vadd.f32 %v2026_v42, %v1006_v59  ;;  %v1010_v1 = vpop.f32.mrf.mxu1 }
 0x210   : > { %v825_v2 = vpop.f32.mrf.mxu0 }
 0x211   : > { %v1172_v3 = vsel %vm1151_vm14, %v1046_v63, %v2029_v6  ;;  %v1011_v4 = vadd.f32 %v1010_v1, %v825_v2  ;;  %v1594_v5 = vpop.f32.mrf.mxu1 }
 0x212   : > { %1188 = vst.msk [vmem:[%s1835_s20 + $0x50] sm:$0xff] %vm1177_vm4, %v1172_v3  ;;  %v1545_v7 = vpop.f32.mrf.mxu0 }
 0x213   : > { %v1047_v9 = vadd.f32 %v2026_v42, %v1011_v4  ;;  %v1015_v10 = vpop.f32.mrf.mxu1 }
 0x214   : > { %v830_v11 = vpop.f32.mrf.mxu0 }
 0x215   : > { %v1173_v12 = vsel %vm1152_vm15, %v1047_v9, %v2029_v6  ;;  %v1016_v13 = vadd.f32 %v1015_v10, %v830_v11  ;;  %v1597_v14 = vpop.f32.mrf.mxu1 }
 0x216   : > { %1189 = vst.msk [vmem:[%s1835_s20 + $0x58] sm:$0xff] %vm1177_vm4, %v1173_v12  ;;  %v1548_v15 = vpop.f32.mrf.mxu0 }
 0x217   : > { %v1048_v17 = vadd.f32 %v2026_v42, %v1016_v13  ;;  %v1020_v18 = vpop.f32.mrf.mxu1 }
 0x218   : > { %v835_v19 = vpop.f32.mrf.mxu0 }
 0x219   : > { %v1174_v21 = vsel %vm1153_vm0, %v1048_v17, %v2029_v6  ;;  %v1021_v22 = vadd.f32 %v1020_v18, %v835_v19  ;;  %v1600_v23 = vpop.f32.mrf.mxu1 }
 0x21a   : > { %1190 = vst.msk [vmem:[%s1835_s20 + $0x60] sm:$0xff] %vm1177_vm4, %v1174_v21  ;;  %v1551_v24 = vpop.f32.mrf.mxu0 }
 0x21b   : > { %v1049_v25 = vadd.f32 %v2026_v42, %v1021_v22  ;;  %v1025_v26 = vpop.f32.mrf.mxu1 }
 0x21c   : > { %v840_v27 = vpop.f32.mrf.mxu0 }
 0x21d   : > { %v1175_v29 = vsel %vm1154_vm2, %v1049_v25, %v2029_v6  ;;  %v1026_v30 = vadd.f32 %v1025_v26, %v840_v27  ;;  %v1603_v31 = vpop.f32.mrf.mxu1 }
 0x21e   : > { %1191 = vst.msk [vmem:[%s1835_s20 + $0x68] sm:$0xff] %vm1177_vm4, %v1175_v29  ;;  %v1554_v32 = vpop.f32.mrf.mxu0 }
 0x21f   : > { %v1050_v33 = vadd.f32 %v2026_v42, %v1026_v30 }
 0x221   : > { %v1176_v34 = vsel %vm1155_vm3, %v1050_v33, %v2029_v6 }
 0x222   : > { %1192 = vst.msk [vmem:[%s1835_s20 + $0x70] sm:$0xff] %vm1177_vm4, %v1176_v34 }
 0x223 PF: > { %s25_s17 = sadd.s32 1, %s1710_s17   ;;  %s2120_s14 = smov %s1702_s16 }
 0x224   : > { %p22_p0 = scmp.ge.s32.totalorder %s25_s17, 6   ;;  %s2121_s15 = smov %s1706_s0 }
 0x225   : > { %s2122_s16 = smov %s2125_s18  ;;  %s2123_s0 = smov %s2129_s19 }
 0x226   :  { %24 = sbr.rel (!%p22_p0) target bundleno = 19 (0x13), region = 99 }

</bundles_post_ra>
